<compile_context>
chip_gen: v6e
topology: v6e:2x2x1
jax: 0.10.0
libtpu: 0.0.40
codegen_flags: <defaults>
</compile_context>

<pallas_src>
import functools

import jax
import jax.numpy as jnp
import numpy as np
from jax import lax
from jax.experimental import pallas as pl
from jax.experimental.pallas import tpu as pltpu

_SUBLANE = 8  # f32 sublane tile


def _make_lstm_kernel(T, Bp, H, D, unroll_threshold=64):
    """Fused-direction LSTM kernel for static (T, padded batch Bp, H, D)."""
    DH = D * H          # fused hidden width  (fwd | bwd columns)
    GF = 4 * DH         # fused gate width    ([i | f | o | g] blocks of DH)

    def kernel(x_ref, wih_ref, whh_ref, b_ref, out_ref, gx_scr):
        # x_ref   : (T*Bp, D*I)  time-major input; bwd half of features is the
        #                        time-REVERSED sequence (built in the wrapper)
        # wih_ref : (D*I, GF)    fused input->gates weight (block structured)
        # whh_ref : (DH,  GF)    fused hidden->gates weight (block structured)
        # b_ref   : (1,   GF)    fused b_ih + b_hh
        # out_ref : (T, Bp, DH)  per-step h, leading time index
        # gx_scr  : (T*Bp, GF)   VMEM scratch: hoisted input projection

        # ---- Hoisted, time-independent input projection (one MXU matmul) ----
        gx_scr[...] = (
            jnp.dot(x_ref[...], wih_ref[...], preferred_element_type=jnp.float32)
            + b_ref[...]
        )

        whh = whh_ref[...]  # recurrent weights stay resident across the loop

        def step(t, row, h, c):
            # row is an aligned multiple of Bp (Bp itself a multiple of 8):
            # full-tile, unmasked load of this step's precomputed projection.
            gates = gx_scr[pl.ds(row, Bp), :] + jnp.dot(
                h, whh, preferred_element_type=jnp.float32)

            # Fused gate columns: [i | f | o | g], each block DH wide
            # (within a block: fwd H lanes then bwd H lanes).
            sig = jax.nn.sigmoid(gates[:, : 3 * DH])   # i, f, o
            g_g = jnp.tanh(gates[:, 3 * DH:])          # g
            i_g = sig[:, 0 * DH:1 * DH]
            f_g = sig[:, 1 * DH:2 * DH]
            o_g = sig[:, 2 * DH:3 * DH]

            c = f_g * c + i_g * g_g
            h = o_g * jnp.tanh(c)

            # Leading-dim time index -> full (Bp, DH) tile store into the
            # VMEM-resident output block (single HBM writeback at the end).
            out_ref[t] = h
            return h, c

        h0 = jnp.zeros((Bp, DH), jnp.float32)
        c0 = jnp.zeros((Bp, DH), jnp.float32)

        if T <= unroll_threshold:
            # Fully unrolled: every address is a static Python int.
            h, c = h0, c0
            for s in range(T):
                h, c = step(s, s * Bp, h, c)
        else:
            # Large-T fallback: bounded code size / vreg pressure.
            def body(s, carry):
                h, c = carry
                row = pl.multiple_of(s * Bp, Bp)
                return step(s, row, h, c)
            lax.fori_loop(0, T, body, (h0, c0), unroll=8)

    return kernel


def build_fused_params(raw, *, hidden_size, bidirectional):
    """Pack per-direction PyTorch-layout LSTM weights into the fused layout.

    raw[d] = {"w_ih": (4H, I), "w_hh": (4H, H), "b_ih": (4H,), "b_hh": (4H,)}
    with PyTorch gate order [i, f, g, o].

    Fused layout (kernel gate order [i, f, o, g], directions interleaved):
      columns  [(gk*D + d)*H : (gk*D + d + 1)*H]  hold gate gk of direction d,
      W_ih rows d*I:(d+1)*I feed direction d (bwd rows multiply the
      time-reversed input), W_hh rows d*H:(d+1)*H feed direction d.
    """
    D = 2 if bidirectional else 1
    H = hidden_size
    I = raw[0]["w_ih"].shape[1]
    GF = 4 * D * H
    kernel_gate_to_torch = (0, 1, 3, 2)  # kernel [i,f,o,g] <- torch [i,f,g,o]

    wih = np.zeros((D * I, GF), np.float32)
    whh = np.zeros((D * H, GF), np.float32)
    b = np.zeros((1, GF), np.float32)
    for d in range(D):
        w_ih_d = np.asarray(raw[d]["w_ih"], np.float32)   # (4H, I)
        w_hh_d = np.asarray(raw[d]["w_hh"], np.float32)   # (4H, H)
        b_d = (np.asarray(raw[d]["b_ih"], np.float32)
               + np.asarray(raw[d]["b_hh"], np.float32))  # (4H,)
        for gk, gt in enumerate(kernel_gate_to_torch):
            col = (gk * D + d) * H
            wih[d * I:(d + 1) * I, col:col + H] = w_ih_d[gt * H:(gt + 1) * H, :].T
            whh[d * H:(d + 1) * H, col:col + H] = w_hh_d[gt * H:(gt + 1) * H, :].T
            b[0, col:col + H] = b_d[gt * H:(gt + 1) * H]
    return {"wih": jnp.asarray(wih), "whh": jnp.asarray(whh), "b": jnp.asarray(b)}


def sequential_lstm_forward(x, fused_params, *, hidden_size, bidirectional):
    """Equivalent of sequential_LTSM.forward.

    x : (B, input_size, T) -- the module permutes to (B, T, input_size) and
        runs a batch_first (bi)LSTM; returns (B, T, hidden_size * D), float32.
    """
    x = x.astype(jnp.float32)
    B, I, T = x.shape
    D = 2 if bidirectional else 1
    H = hidden_size
    DH = D * H
    GF = 4 * DH
    Bp = ((B + _SUBLANE - 1) // _SUBLANE) * _SUBLANE  # pad batch to sublane tile

    wih_f, whh_f, b_f = fused_params["wih"], fused_params["whh"], fused_params["b"]
    assert wih_f.shape == (D * I, GF), wih_f.shape
    assert whh_f.shape == (DH, GF), whh_f.shape

    # Time-major input; backward direction pre-reversed and stacked on features
    # so the kernel's time index is static for both directions.
    x_tbi = jnp.transpose(x, (2, 0, 1))                       # (T, B, I)
    if D == 2:
        x_both = jnp.concatenate([x_tbi, x_tbi[::-1]], axis=-1)  # (T, B, 2I)
    else:
        x_both = x_tbi
    if Bp != B:
        x_both = jnp.pad(x_both, ((0, 0), (0, Bp - B), (0, 0)))
    x2d = x_both.reshape(T * Bp, D * I)

    grid_spec = pltpu.PrefetchScalarGridSpec(
        num_scalar_prefetch=0,
        grid=(1,),  # both directions fused -> single serial invocation
        in_specs=[
            pl.BlockSpec((T * Bp, D * I), lambda i: (0, 0)),
            pl.BlockSpec((D * I, GF), lambda i: (0, 0)),
            pl.BlockSpec((DH, GF), lambda i: (0, 0)),
            pl.BlockSpec((1, GF), lambda i: (0, 0)),
        ],
        out_specs=pl.BlockSpec((T, Bp, DH), lambda i: (0, 0, 0)),
        scratch_shapes=[
            pltpu.VMEM((T * Bp, GF), jnp.float32),  # hoisted x @ W_ih + b
        ],
    )

    cost = pl.CostEstimate(
        flops=2 * T * Bp * (D * I + DH) * GF,
        transcendentals=5 * T * Bp * DH,
        bytes_accessed=4 * (T * Bp * D * I + D * I * GF + DH * GF + GF
                            + T * Bp * DH),
    )

    out = pl.pallas_call(
        _make_lstm_kernel(T, Bp, H, D),
        out_shape=jax.ShapeDtypeStruct((T, Bp, DH), jnp.float32),
        grid_spec=grid_spec,
        compiler_params=pltpu.CompilerParams(
            dimension_semantics=("arbitrary",)),
        cost_estimate=cost,
    )(x2d, wih_f, whh_f, b_f)

    # Drop batch padding; un-reverse the backward half; -> (B, T, D*H).
    out = out[:, :B, :]                                   # (T, B, DH)
    if D == 2:
        fwd = out[:, :, :H]                               # h_fwd(t)
        bwd = out[::-1, :, H:]                            # h_bwd(t) (un-reversed)
        out = jnp.concatenate([fwd, bwd], axis=-1)
    return jnp.transpose(out, (1, 0, 2))                  # (B, T, D*H)


# ----------------------------- pure-JAX reference -----------------------------
def _ref_lstm_direction(x_tbi, w_ih, w_hh, b_ih, b_hh, *, reverse):
    # PyTorch layouts: w_ih (4H, I), w_hh (4H, H), gate order [i, f, g, o].
    T, B, _ = x_tbi.shape
    H = w_hh.shape[1]
    xs = x_tbi[::-1] if reverse else x_tbi

    def step(carry, x_t):
        h, c = carry
        gates = x_t @ w_ih.T + h @ w_hh.T + b_ih + b_hh
        i_g = jax.nn.sigmoid(gates[:, 0 * H:1 * H])
        f_g = jax.nn.sigmoid(gates[:, 1 * H:2 * H])
        g_g = jnp.tanh(gates[:, 2 * H:3 * H])
        o_g = jax.nn.sigmoid(gates[:, 3 * H:4 * H])
        c = f_g * c + i_g * g_g
        h = o_g * jnp.tanh(c)
        return (h, c), h

    init = (jnp.zeros((B, H), jnp.float32), jnp.zeros((B, H), jnp.float32))
    _, hs = jax.lax.scan(step, init, xs)
    if reverse:
        hs = hs[::-1]
    return hs


def ref_forward(x, raw, *, hidden_size, bidirectional):
    x_tbi = jnp.transpose(x.astype(jnp.float32), (2, 0, 1))
    D = 2 if bidirectional else 1
    outs = []
    for d in range(D):
        hs = _ref_lstm_direction(
            x_tbi,
            jnp.asarray(raw[d]["w_ih"]), jnp.asarray(raw[d]["w_hh"]),
            jnp.asarray(raw[d]["b_ih"]), jnp.asarray(raw[d]["b_hh"]),
            reverse=(d == 1))
        outs.append(jnp.transpose(hs, (1, 0, 2)))
    return jnp.concatenate(outs, axis=-1)


# ---------------------------------- main ---------------------------------------
if __name__ == "__main__":
    # sequential_LTSM(input_size=4, hidden_size=32, batch_first=True, bidirectional=True)
    B, I, T, H = 2, 4, 8, 32
    bidirectional = True
    D = 2 if bidirectional else 1

    key = jax.random.PRNGKey(0)
    k = 1.0 / np.sqrt(H)  # PyTorch LSTM default init: U(-1/sqrt(H), 1/sqrt(H))
    keys = jax.random.split(key, 4 * D + 1)

    def u(kk, shape):
        return jax.random.uniform(kk, shape, jnp.float32, minval=-k, maxval=k)

    # Per-direction weights in PyTorch layout / gate order.
    raw = []
    for d in range(D):
        kw = keys[4 * d:4 * d + 4]
        raw.append({
            "w_ih": u(kw[0], (4 * H, I)),
            "w_hh": u(kw[1], (4 * H, H)),
            "b_ih": u(kw[2], (4 * H,)),
            "b_hh": u(kw[3], (4 * H,)),
        })
    x = jax.random.normal(keys[-1], (B, I, T), jnp.float32)  # module input (N, C, L)

    fused = build_fused_params(raw, hidden_size=H, bidirectional=bidirectional)

    fwd_fn = jax.jit(functools.partial(
        sequential_lstm_forward, hidden_size=H, bidirectional=bidirectional))
    out = jax.block_until_ready(fwd_fn(x, fused))

    expected = ref_forward(x, raw, hidden_size=H, bidirectional=bidirectional)
    assert out.shape == (B, T, H * D), out.shape
    np.testing.assert_allclose(np.asarray(out), np.asarray(expected),
                               atol=1e-5, rtol=1e-5)

    print("KERNEL_OK")
</pallas_src>

<mosaic_0001>
module attributes {stable_mosaic.version = 11 : i64} {
  func.func @kernel(%arg0: i32, %arg1: memref<64x8xf32, #tpu.memory_space<vmem>>, %arg2: memref<8x256xf32, #tpu.memory_space<vmem>>, %arg3: memref<64x256xf32, #tpu.memory_space<vmem>>, %arg4: memref<1x256xf32, #tpu.memory_space<vmem>>, %arg5: memref<8x8x64xf32, #tpu.memory_space<vmem>>, %arg6: memref<64x256xf32, #tpu.memory_space<vmem>>) attributes {dimension_semantics = [#tpu.dimension_semantics<arbitrary>], iteration_bounds = array<i64: 1>, scalar_prefetch = 0 : i64, scratch_operands = 1 : i64, tpu.core_type = #tpu.core_type<tc>, window_params = [{pipeline_mode = #tpu.pipeline_mode<synchronous>, transform_indices = @transform_0, window_bounds = array<i64: 64, 8>}, {pipeline_mode = #tpu.pipeline_mode<synchronous>, transform_indices = @transform_1, window_bounds = array<i64: 8, 256>}, {pipeline_mode = #tpu.pipeline_mode<synchronous>, transform_indices = @transform_2, window_bounds = array<i64: 64, 256>}, {pipeline_mode = #tpu.pipeline_mode<synchronous>, transform_indices = @transform_3, window_bounds = array<i64: 1, 256>}, {pipeline_mode = #tpu.pipeline_mode<synchronous>, transform_indices = @transform_4, window_bounds = array<i64: 8, 8, 64>}]} {
    %c0 = arith.constant 0 : index
    %c0_0 = arith.constant 0 : index
    %0 = vector.load %arg1[%c0, %c0_0] : memref<64x8xf32, #tpu.memory_space<vmem>>, vector<64x8xf32>
    %c0_1 = arith.constant 0 : index
    %c0_2 = arith.constant 0 : index
    %1 = vector.load %arg2[%c0_1, %c0_2] : memref<8x256xf32, #tpu.memory_space<vmem>>, vector<8x256xf32>
    %cst = arith.constant dense<0.000000e+00> : vector<64x256xf32>
    %2 = tpu.matmul %0, %1, %cst {dimension_numbers = #tpu.dot_dimension_numbers<[1], [0], [0], [1], [0, 0, 1, 1], [], []>} : vector<64x8xf32>, vector<8x256xf32>, vector<64x256xf32> -> vector<64x256xf32>
    %c0_3 = arith.constant 0 : index
    %c0_4 = arith.constant 0 : index
    %3 = vector.load %arg4[%c0_3, %c0_4] : memref<1x256xf32, #tpu.memory_space<vmem>>, vector<1x256xf32>
    %4 = vector.broadcast %3 : vector<1x256xf32> to vector<64x256xf32>
    %5 = arith.addf %2, %4 : vector<64x256xf32>
    %c0_5 = arith.constant 0 : index
    %c0_6 = arith.constant 0 : index
    %6 = vector.load %arg6[%c0_5, %c0_6] : memref<64x256xf32, #tpu.memory_space<vmem>>, vector<64x256xf32>
    tpu.vector_store %arg6[%c0_5, %c0_6], %5 {strides = array<i32>} : memref<64x256xf32, #tpu.memory_space<vmem>>, vector<64x256xf32>,
    %c0_7 = arith.constant 0 : index
    %c0_8 = arith.constant 0 : index
    %7 = vector.load %arg3[%c0_7, %c0_8] : memref<64x256xf32, #tpu.memory_space<vmem>>, vector<64x256xf32>
    %cst_9 = arith.constant 0.000000e+00 : f32
    %8 = vector.broadcast %cst_9 : f32 to vector<8x64xf32>
    %cst_10 = arith.constant 0.000000e+00 : f32
    %9 = vector.broadcast %cst_10 : f32 to vector<8x64xf32>
    %c0_11 = arith.constant 0 : index
    %c0_12 = arith.constant 0 : index
    %10 = vector.load %arg6[%c0_11, %c0_12] : memref<64x256xf32, #tpu.memory_space<vmem>>, vector<8x256xf32>
    %cst_13 = arith.constant dense<0.000000e+00> : vector<8x256xf32>
    %11 = tpu.matmul %8, %7, %cst_13 {dimension_numbers = #tpu.dot_dimension_numbers<[1], [0], [0], [1], [0, 0, 1, 1], [], []>} : vector<8x64xf32>, vector<64x256xf32>, vector<8x256xf32> -> vector<8x256xf32>
    %12 = arith.addf %10, %11 : vector<8x256xf32>
    %13 = vector.extract_strided_slice %12 {offsets = [0, 0], sizes = [8, 192], strides = [1, 1]} : vector<8x256xf32> to vector<8x192xf32>
    %14 = arith.negf %13 : vector<8x192xf32>
    %15 = math.exp %14 : vector<8x192xf32>
    %cst_14 = arith.constant 1.000000e+00 : f32
    %16 = vector.broadcast %cst_14 : f32 to vector<8x192xf32>
    %17 = arith.addf %16, %15 : vector<8x192xf32>
    %18 = arith.divf %16, %17 : vector<8x192xf32>
    %19 = vector.extract_strided_slice %12 {offsets = [0, 192], sizes = [8, 64], strides = [1, 1]} : vector<8x256xf32> to vector<8x64xf32>
    %20 = math.tanh %19 : vector<8x64xf32>
    %21 = vector.extract_strided_slice %18 {offsets = [0, 0], sizes = [8, 64], strides = [1, 1]} : vector<8x192xf32> to vector<8x64xf32>
    %22 = vector.extract_strided_slice %18 {offsets = [0, 64], sizes = [8, 64], strides = [1, 1]} : vector<8x192xf32> to vector<8x64xf32>
    %23 = vector.extract_strided_slice %18 {offsets = [0, 128], sizes = [8, 64], strides = [1, 1]} : vector<8x192xf32> to vector<8x64xf32>
    %24 = arith.mulf %22, %9 : vector<8x64xf32>
    %25 = arith.mulf %21, %20 : vector<8x64xf32>
    %26 = arith.addf %24, %25 : vector<8x64xf32>
    %27 = math.tanh %26 : vector<8x64xf32>
    %28 = arith.mulf %23, %27 : vector<8x64xf32>
    %c0_15 = arith.constant 0 : index
    %c0_16 = arith.constant 0 : index
    %c0_17 = arith.constant 0 : index
    %29 = vector.load %arg5[%c0_15, %c0_16, %c0_17] : memref<8x8x64xf32, #tpu.memory_space<vmem>>, vector<1x8x64xf32>
    %30 = vector.shape_cast %29 : vector<1x8x64xf32> to vector<8x64xf32>
    %31 = vector.shape_cast %28 : vector<8x64xf32> to vector<1x8x64xf32>
    tpu.vector_store %arg5[%c0_15, %c0_16, %c0_17], %31 {strides = array<i32>} : memref<8x8x64xf32, #tpu.memory_space<vmem>>, vector<1x8x64xf32>,
    %c8 = arith.constant 8 : index
    %c0_18 = arith.constant 0 : index
    %32 = vector.load %arg6[%c8, %c0_18] : memref<64x256xf32, #tpu.memory_space<vmem>>, vector<8x256xf32>
    %cst_19 = arith.constant dense<0.000000e+00> : vector<8x256xf32>
    %33 = tpu.matmul %28, %7, %cst_19 {dimension_numbers = #tpu.dot_dimension_numbers<[1], [0], [0], [1], [0, 0, 1, 1], [], []>} : vector<8x64xf32>, vector<64x256xf32>, vector<8x256xf32> -> vector<8x256xf32>
    %34 = arith.addf %32, %33 : vector<8x256xf32>
    %35 = vector.extract_strided_slice %34 {offsets = [0, 0], sizes = [8, 192], strides = [1, 1]} : vector<8x256xf32> to vector<8x192xf32>
    %36 = arith.negf %35 : vector<8x192xf32>
    %37 = math.exp %36 : vector<8x192xf32>
    %cst_20 = arith.constant 1.000000e+00 : f32
    %38 = vector.broadcast %cst_20 : f32 to vector<8x192xf32>
    %39 = arith.addf %38, %37 : vector<8x192xf32>
    %40 = arith.divf %38, %39 : vector<8x192xf32>
    %41 = vector.extract_strided_slice %34 {offsets = [0, 192], sizes = [8, 64], strides = [1, 1]} : vector<8x256xf32> to vector<8x64xf32>
    %42 = math.tanh %41 : vector<8x64xf32>
    %43 = vector.extract_strided_slice %40 {offsets = [0, 0], sizes = [8, 64], strides = [1, 1]} : vector<8x192xf32> to vector<8x64xf32>
    %44 = vector.extract_strided_slice %40 {offsets = [0, 64], sizes = [8, 64], strides = [1, 1]} : vector<8x192xf32> to vector<8x64xf32>
    %45 = vector.extract_strided_slice %40 {offsets = [0, 128], sizes = [8, 64], strides = [1, 1]} : vector<8x192xf32> to vector<8x64xf32>
    %46 = arith.mulf %44, %26 : vector<8x64xf32>
    %47 = arith.mulf %43, %42 : vector<8x64xf32>
    %48 = arith.addf %46, %47 : vector<8x64xf32>
    %49 = math.tanh %48 : vector<8x64xf32>
    %50 = arith.mulf %45, %49 : vector<8x64xf32>
    %c1 = arith.constant 1 : index
    %c0_21 = arith.constant 0 : index
    %c0_22 = arith.constant 0 : index
    %51 = vector.load %arg5[%c1, %c0_21, %c0_22] : memref<8x8x64xf32, #tpu.memory_space<vmem>>, vector<1x8x64xf32>
    %52 = vector.shape_cast %51 : vector<1x8x64xf32> to vector<8x64xf32>
    %53 = vector.shape_cast %50 : vector<8x64xf32> to vector<1x8x64xf32>
    tpu.vector_store %arg5[%c1, %c0_21, %c0_22], %53 {strides = array<i32>} : memref<8x8x64xf32, #tpu.memory_space<vmem>>, vector<1x8x64xf32>,
    %c16 = arith.constant 16 : index
    %c0_23 = arith.constant 0 : index
    %54 = vector.load %arg6[%c16, %c0_23] : memref<64x256xf32, #tpu.memory_space<vmem>>, vector<8x256xf32>
    %cst_24 = arith.constant dense<0.000000e+00> : vector<8x256xf32>
    %55 = tpu.matmul %50, %7, %cst_24 {dimension_numbers = #tpu.dot_dimension_numbers<[1], [0], [0], [1], [0, 0, 1, 1], [], []>} : vector<8x64xf32>, vector<64x256xf32>, vector<8x256xf32> -> vector<8x256xf32>
    %56 = arith.addf %54, %55 : vector<8x256xf32>
    %57 = vector.extract_strided_slice %56 {offsets = [0, 0], sizes = [8, 192], strides = [1, 1]} : vector<8x256xf32> to vector<8x192xf32>
    %58 = arith.negf %57 : vector<8x192xf32>
    %59 = math.exp %58 : vector<8x192xf32>
    %cst_25 = arith.constant 1.000000e+00 : f32
    %60 = vector.broadcast %cst_25 : f32 to vector<8x192xf32>
    %61 = arith.addf %60, %59 : vector<8x192xf32>
    %62 = arith.divf %60, %61 : vector<8x192xf32>
    %63 = vector.extract_strided_slice %56 {offsets = [0, 192], sizes = [8, 64], strides = [1, 1]} : vector<8x256xf32> to vector<8x64xf32>
    %64 = math.tanh %63 : vector<8x64xf32>
    %65 = vector.extract_strided_slice %62 {offsets = [0, 0], sizes = [8, 64], strides = [1, 1]} : vector<8x192xf32> to vector<8x64xf32>
    %66 = vector.extract_strided_slice %62 {offsets = [0, 64], sizes = [8, 64], strides = [1, 1]} : vector<8x192xf32> to vector<8x64xf32>
    %67 = vector.extract_strided_slice %62 {offsets = [0, 128], sizes = [8, 64], strides = [1, 1]} : vector<8x192xf32> to vector<8x64xf32>
    %68 = arith.mulf %66, %48 : vector<8x64xf32>
    %69 = arith.mulf %65, %64 : vector<8x64xf32>
    %70 = arith.addf %68, %69 : vector<8x64xf32>
    %71 = math.tanh %70 : vector<8x64xf32>
    %72 = arith.mulf %67, %71 : vector<8x64xf32>
    %c2 = arith.constant 2 : index
    %c0_26 = arith.constant 0 : index
    %c0_27 = arith.constant 0 : index
    %73 = vector.load %arg5[%c2, %c0_26, %c0_27] : memref<8x8x64xf32, #tpu.memory_space<vmem>>, vector<1x8x64xf32>
    %74 = vector.shape_cast %73 : vector<1x8x64xf32> to vector<8x64xf32>
    %75 = vector.shape_cast %72 : vector<8x64xf32> to vector<1x8x64xf32>
    tpu.vector_store %arg5[%c2, %c0_26, %c0_27], %75 {strides = array<i32>} : memref<8x8x64xf32, #tpu.memory_space<vmem>>, vector<1x8x64xf32>,
    %c24 = arith.constant 24 : index
    %c0_28 = arith.constant 0 : index
    %76 = vector.load %arg6[%c24, %c0_28] : memref<64x256xf32, #tpu.memory_space<vmem>>, vector<8x256xf32>
    %cst_29 = arith.constant dense<0.000000e+00> : vector<8x256xf32>
    %77 = tpu.matmul %72, %7, %cst_29 {dimension_numbers = #tpu.dot_dimension_numbers<[1], [0], [0], [1], [0, 0, 1, 1], [], []>} : vector<8x64xf32>, vector<64x256xf32>, vector<8x256xf32> -> vector<8x256xf32>
    %78 = arith.addf %76, %77 : vector<8x256xf32>
    %79 = vector.extract_strided_slice %78 {offsets = [0, 0], sizes = [8, 192], strides = [1, 1]} : vector<8x256xf32> to vector<8x192xf32>
    %80 = arith.negf %79 : vector<8x192xf32>
    %81 = math.exp %80 : vector<8x192xf32>
    %cst_30 = arith.constant 1.000000e+00 : f32
    %82 = vector.broadcast %cst_30 : f32 to vector<8x192xf32>
    %83 = arith.addf %82, %81 : vector<8x192xf32>
    %84 = arith.divf %82, %83 : vector<8x192xf32>
    %85 = vector.extract_strided_slice %78 {offsets = [0, 192], sizes = [8, 64], strides = [1, 1]} : vector<8x256xf32> to vector<8x64xf32>
    %86 = math.tanh %85 : vector<8x64xf32>
    %87 = vector.extract_strided_slice %84 {offsets = [0, 0], sizes = [8, 64], strides = [1, 1]} : vector<8x192xf32> to vector<8x64xf32>
    %88 = vector.extract_strided_slice %84 {offsets = [0, 64], sizes = [8, 64], strides = [1, 1]} : vector<8x192xf32> to vector<8x64xf32>
    %89 = vector.extract_strided_slice %84 {offsets = [0, 128], sizes = [8, 64], strides = [1, 1]} : vector<8x192xf32> to vector<8x64xf32>
    %90 = arith.mulf %88, %70 : vector<8x64xf32>
    %91 = arith.mulf %87, %86 : vector<8x64xf32>
    %92 = arith.addf %90, %91 : vector<8x64xf32>
    %93 = math.tanh %92 : vector<8x64xf32>
    %94 = arith.mulf %89, %93 : vector<8x64xf32>
    %c3 = arith.constant 3 : index
    %c0_31 = arith.constant 0 : index
    %c0_32 = arith.constant 0 : index
    %95 = vector.load %arg5[%c3, %c0_31, %c0_32] : memref<8x8x64xf32, #tpu.memory_space<vmem>>, vector<1x8x64xf32>
    %96 = vector.shape_cast %95 : vector<1x8x64xf32> to vector<8x64xf32>
    %97 = vector.shape_cast %94 : vector<8x64xf32> to vector<1x8x64xf32>
    tpu.vector_store %arg5[%c3, %c0_31, %c0_32], %97 {strides = array<i32>} : memref<8x8x64xf32, #tpu.memory_space<vmem>>, vector<1x8x64xf32>,
    %c32 = arith.constant 32 : index
    %c0_33 = arith.constant 0 : index
    %98 = vector.load %arg6[%c32, %c0_33] : memref<64x256xf32, #tpu.memory_space<vmem>>, vector<8x256xf32>
    %cst_34 = arith.constant dense<0.000000e+00> : vector<8x256xf32>
    %99 = tpu.matmul %94, %7, %cst_34 {dimension_numbers = #tpu.dot_dimension_numbers<[1], [0], [0], [1], [0, 0, 1, 1], [], []>} : vector<8x64xf32>, vector<64x256xf32>, vector<8x256xf32> -> vector<8x256xf32>
    %100 = arith.addf %98, %99 : vector<8x256xf32>
    %101 = vector.extract_strided_slice %100 {offsets = [0, 0], sizes = [8, 192], strides = [1, 1]} : vector<8x256xf32> to vector<8x192xf32>
    %102 = arith.negf %101 : vector<8x192xf32>
    %103 = math.exp %102 : vector<8x192xf32>
    %cst_35 = arith.constant 1.000000e+00 : f32
    %104 = vector.broadcast %cst_35 : f32 to vector<8x192xf32>
    %105 = arith.addf %104, %103 : vector<8x192xf32>
    %106 = arith.divf %104, %105 : vector<8x192xf32>
    %107 = vector.extract_strided_slice %100 {offsets = [0, 192], sizes = [8, 64], strides = [1, 1]} : vector<8x256xf32> to vector<8x64xf32>
    %108 = math.tanh %107 : vector<8x64xf32>
    %109 = vector.extract_strided_slice %106 {offsets = [0, 0], sizes = [8, 64], strides = [1, 1]} : vector<8x192xf32> to vector<8x64xf32>
    %110 = vector.extract_strided_slice %106 {offsets = [0, 64], sizes = [8, 64], strides = [1, 1]} : vector<8x192xf32> to vector<8x64xf32>
    %111 = vector.extract_strided_slice %106 {offsets = [0, 128], sizes = [8, 64], strides = [1, 1]} : vector<8x192xf32> to vector<8x64xf32>
    %112 = arith.mulf %110, %92 : vector<8x64xf32>
    %113 = arith.mulf %109, %108 : vector<8x64xf32>
    %114 = arith.addf %112, %113 : vector<8x64xf32>
    %115 = math.tanh %114 : vector<8x64xf32>
    %116 = arith.mulf %111, %115 : vector<8x64xf32>
    %c4 = arith.constant 4 : index
    %c0_36 = arith.constant 0 : index
    %c0_37 = arith.constant 0 : index
    %117 = vector.load %arg5[%c4, %c0_36, %c0_37] : memref<8x8x64xf32, #tpu.memory_space<vmem>>, vector<1x8x64xf32>
    %118 = vector.shape_cast %117 : vector<1x8x64xf32> to vector<8x64xf32>
    %119 = vector.shape_cast %116 : vector<8x64xf32> to vector<1x8x64xf32>
    tpu.vector_store %arg5[%c4, %c0_36, %c0_37], %119 {strides = array<i32>} : memref<8x8x64xf32, #tpu.memory_space<vmem>>, vector<1x8x64xf32>,
    %c40 = arith.constant 40 : index
    %c0_38 = arith.constant 0 : index
    %120 = vector.load %arg6[%c40, %c0_38] : memref<64x256xf32, #tpu.memory_space<vmem>>, vector<8x256xf32>
    %cst_39 = arith.constant dense<0.000000e+00> : vector<8x256xf32>
    %121 = tpu.matmul %116, %7, %cst_39 {dimension_numbers = #tpu.dot_dimension_numbers<[1], [0], [0], [1], [0, 0, 1, 1], [], []>} : vector<8x64xf32>, vector<64x256xf32>, vector<8x256xf32> -> vector<8x256xf32>
    %122 = arith.addf %120, %121 : vector<8x256xf32>
    %123 = vector.extract_strided_slice %122 {offsets = [0, 0], sizes = [8, 192], strides = [1, 1]} : vector<8x256xf32> to vector<8x192xf32>
    %124 = arith.negf %123 : vector<8x192xf32>
    %125 = math.exp %124 : vector<8x192xf32>
    %cst_40 = arith.constant 1.000000e+00 : f32
    %126 = vector.broadcast %cst_40 : f32 to vector<8x192xf32>
    %127 = arith.addf %126, %125 : vector<8x192xf32>
    %128 = arith.divf %126, %127 : vector<8x192xf32>
    %129 = vector.extract_strided_slice %122 {offsets = [0, 192], sizes = [8, 64], strides = [1, 1]} : vector<8x256xf32> to vector<8x64xf32>
    %130 = math.tanh %129 : vector<8x64xf32>
    %131 = vector.extract_strided_slice %128 {offsets = [0, 0], sizes = [8, 64], strides = [1, 1]} : vector<8x192xf32> to vector<8x64xf32>
    %132 = vector.extract_strided_slice %128 {offsets = [0, 64], sizes = [8, 64], strides = [1, 1]} : vector<8x192xf32> to vector<8x64xf32>
    %133 = vector.extract_strided_slice %128 {offsets = [0, 128], sizes = [8, 64], strides = [1, 1]} : vector<8x192xf32> to vector<8x64xf32>
    %134 = arith.mulf %132, %114 : vector<8x64xf32>
    %135 = arith.mulf %131, %130 : vector<8x64xf32>
    %136 = arith.addf %134, %135 : vector<8x64xf32>
    %137 = math.tanh %136 : vector<8x64xf32>
    %138 = arith.mulf %133, %137 : vector<8x64xf32>
    %c5 = arith.constant 5 : index
    %c0_41 = arith.constant 0 : index
    %c0_42 = arith.constant 0 : index
    %139 = vector.load %arg5[%c5, %c0_41, %c0_42] : memref<8x8x64xf32, #tpu.memory_space<vmem>>, vector<1x8x64xf32>
    %140 = vector.shape_cast %139 : vector<1x8x64xf32> to vector<8x64xf32>
    %141 = vector.shape_cast %138 : vector<8x64xf32> to vector<1x8x64xf32>
    tpu.vector_store %arg5[%c5, %c0_41, %c0_42], %141 {strides = array<i32>} : memref<8x8x64xf32, #tpu.memory_space<vmem>>, vector<1x8x64xf32>,
    %c48 = arith.constant 48 : index
    %c0_43 = arith.constant 0 : index
    %142 = vector.load %arg6[%c48, %c0_43] : memref<64x256xf32, #tpu.memory_space<vmem>>, vector<8x256xf32>
    %cst_44 = arith.constant dense<0.000000e+00> : vector<8x256xf32>
    %143 = tpu.matmul %138, %7, %cst_44 {dimension_numbers = #tpu.dot_dimension_numbers<[1], [0], [0], [1], [0, 0, 1, 1], [], []>} : vector<8x64xf32>, vector<64x256xf32>, vector<8x256xf32> -> vector<8x256xf32>
    %144 = arith.addf %142, %143 : vector<8x256xf32>
    %145 = vector.extract_strided_slice %144 {offsets = [0, 0], sizes = [8, 192], strides = [1, 1]} : vector<8x256xf32> to vector<8x192xf32>
    %146 = arith.negf %145 : vector<8x192xf32>
    %147 = math.exp %146 : vector<8x192xf32>
    %cst_45 = arith.constant 1.000000e+00 : f32
    %148 = vector.broadcast %cst_45 : f32 to vector<8x192xf32>
    %149 = arith.addf %148, %147 : vector<8x192xf32>
    %150 = arith.divf %148, %149 : vector<8x192xf32>
    %151 = vector.extract_strided_slice %144 {offsets = [0, 192], sizes = [8, 64], strides = [1, 1]} : vector<8x256xf32> to vector<8x64xf32>
    %152 = math.tanh %151 : vector<8x64xf32>
    %153 = vector.extract_strided_slice %150 {offsets = [0, 0], sizes = [8, 64], strides = [1, 1]} : vector<8x192xf32> to vector<8x64xf32>
    %154 = vector.extract_strided_slice %150 {offsets = [0, 64], sizes = [8, 64], strides = [1, 1]} : vector<8x192xf32> to vector<8x64xf32>
    %155 = vector.extract_strided_slice %150 {offsets = [0, 128], sizes = [8, 64], strides = [1, 1]} : vector<8x192xf32> to vector<8x64xf32>
    %156 = arith.mulf %154, %136 : vector<8x64xf32>
    %157 = arith.mulf %153, %152 : vector<8x64xf32>
    %158 = arith.addf %156, %157 : vector<8x64xf32>
    %159 = math.tanh %158 : vector<8x64xf32>
    %160 = arith.mulf %155, %159 : vector<8x64xf32>
    %c6 = arith.constant 6 : index
    %c0_46 = arith.constant 0 : index
    %c0_47 = arith.constant 0 : index
    %161 = vector.load %arg5[%c6, %c0_46, %c0_47] : memref<8x8x64xf32, #tpu.memory_space<vmem>>, vector<1x8x64xf32>
    %162 = vector.shape_cast %161 : vector<1x8x64xf32> to vector<8x64xf32>
    %163 = vector.shape_cast %160 : vector<8x64xf32> to vector<1x8x64xf32>
    tpu.vector_store %arg5[%c6, %c0_46, %c0_47], %163 {strides = array<i32>} : memref<8x8x64xf32, #tpu.memory_space<vmem>>, vector<1x8x64xf32>,
    %c56 = arith.constant 56 : index
    %c0_48 = arith.constant 0 : index
    %164 = vector.load %arg6[%c56, %c0_48] : memref<64x256xf32, #tpu.memory_space<vmem>>, vector<8x256xf32>
    %cst_49 = arith.constant dense<0.000000e+00> : vector<8x256xf32>
    %165 = tpu.matmul %160, %7, %cst_49 {dimension_numbers = #tpu.dot_dimension_numbers<[1], [0], [0], [1], [0, 0, 1, 1], [], []>} : vector<8x64xf32>, vector<64x256xf32>, vector<8x256xf32> -> vector<8x256xf32>
    %166 = arith.addf %164, %165 : vector<8x256xf32>
    %167 = vector.extract_strided_slice %166 {offsets = [0, 0], sizes = [8, 192], strides = [1, 1]} : vector<8x256xf32> to vector<8x192xf32>
    %168 = arith.negf %167 : vector<8x192xf32>
    %169 = math.exp %168 : vector<8x192xf32>
    %cst_50 = arith.constant 1.000000e+00 : f32
    %170 = vector.broadcast %cst_50 : f32 to vector<8x192xf32>
    %171 = arith.addf %170, %169 : vector<8x192xf32>
    %172 = arith.divf %170, %171 : vector<8x192xf32>
    %173 = vector.extract_strided_slice %166 {offsets = [0, 192], sizes = [8, 64], strides = [1, 1]} : vector<8x256xf32> to vector<8x64xf32>
    %174 = math.tanh %173 : vector<8x64xf32>
    %175 = vector.extract_strided_slice %172 {offsets = [0, 0], sizes = [8, 64], strides = [1, 1]} : vector<8x192xf32> to vector<8x64xf32>
    %176 = vector.extract_strided_slice %172 {offsets = [0, 64], sizes = [8, 64], strides = [1, 1]} : vector<8x192xf32> to vector<8x64xf32>
    %177 = vector.extract_strided_slice %172 {offsets = [0, 128], sizes = [8, 64], strides = [1, 1]} : vector<8x192xf32> to vector<8x64xf32>
    %178 = arith.mulf %176, %158 : vector<8x64xf32>
    %179 = arith.mulf %175, %174 : vector<8x64xf32>
    %180 = arith.addf %178, %179 : vector<8x64xf32>
    %181 = math.tanh %180 : vector<8x64xf32>
    %182 = arith.mulf %177, %181 : vector<8x64xf32>
    %c7 = arith.constant 7 : index
    %c0_51 = arith.constant 0 : index
    %c0_52 = arith.constant 0 : index
    %183 = vector.load %arg5[%c7, %c0_51, %c0_52] : memref<8x8x64xf32, #tpu.memory_space<vmem>>, vector<1x8x64xf32>
    %184 = vector.shape_cast %183 : vector<1x8x64xf32> to vector<8x64xf32>
    %185 = vector.shape_cast %182 : vector<8x64xf32> to vector<1x8x64xf32>
    tpu.vector_store %arg5[%c7, %c0_51, %c0_52], %185 {strides = array<i32>} : memref<8x8x64xf32, #tpu.memory_space<vmem>>, vector<1x8x64xf32>,
    return
  }
  func.func @transform_0(%arg0: i32) -> (i32, i32) {
    %c0_i32 = arith.constant 0 : i32
    %c0_i32_0 = arith.constant 0 : i32
    %c0_i32_1 = arith.constant 0 : i32
    return %c0_i32, %c0_i32_0 : i32, i32
  }
  func.func @transform_1(%arg0: i32) -> (i32, i32) {
    %c0_i32 = arith.constant 0 : i32
    %c0_i32_0 = arith.constant 0 : i32
    %c0_i32_1 = arith.constant 0 : i32
    return %c0_i32, %c0_i32_0 : i32, i32
  }
  func.func @transform_2(%arg0: i32) -> (i32, i32) {
    %c0_i32 = arith.constant 0 : i32
    %c0_i32_0 = arith.constant 0 : i32
    %c0_i32_1 = arith.constant 0 : i32
    return %c0_i32, %c0_i32_0 : i32, i32
  }
  func.func @transform_3(%arg0: i32) -> (i32, i32) {
    %c0_i32 = arith.constant 0 : i32
    %c0_i32_0 = arith.constant 0 : i32
    %c0_i32_1 = arith.constant 0 : i32
    return %c0_i32, %c0_i32_0 : i32, i32
  }
  func.func @transform_4(%arg0: i32) -> (i32, i32, i32) {
    %c0_i32 = arith.constant 0 : i32
    %c0_i32_0 = arith.constant 0 : i32
    %c0_i32_1 = arith.constant 0 : i32
    %c0_i32_2 = arith.constant 0 : i32
    return %c0_i32, %c0_i32_0, %c0_i32_1 : i32, i32, i32
  }
}

</mosaic_0001>

<bundles_post_ra>
// kernel: sequential_lstm_forward.1
= control target key start
LH: loop header
LB: loop body
LE: loop exit
PB: predicated region body
PF: predicated region fallthrough
CT: control target
= control target key end

     0   :  { %v1229_v3 = vmov 0.0   ;;  %vm39_vm0 = vcmask 64512   ;;  %v29_v20 = vlaneseq  ;;  %s1230_s27 = smov 64   ;;  %vm211_vm1 = vcmask 523264   ;;  %s1633_s2 = inlined_call_operand.vmem [shape: f32[64,256], index: 2, kind: input, shape index: {}]   ;;  %s1634_s1 = inlined_call_operand.vmem [shape: f32[8,256], index: 1, kind: input, shape index: {}]   ;;  %s1635_s0 = inlined_call_operand.vmem [shape: f32[64,8], index: 0, kind: input, shape index: {}]   ;;  %s1636_s3 = inlined_call_operand.vmem [shape: f32[1,256], index: 3, kind: input, shape index: {}]   ;;  %s1637_s4 = inlined_call_operand.vmem [shape: f32[8,8,64], index: 4, kind: output, shape index: {}]  }
   0x1   :  { %v1259_v0 = vld [vmem:[%s1633_s2 + $0x78] sm:$0xff]  ;;  %v1264_v1 = vld [vmem:[%s1633_s2 + $0x70] sm:$0xff]  ;;  %v1269_v2 = vld [vmem:[%s1633_s2 + $0x68] sm:$0xff]  ;;  %128 = vmatprep.mubr.f32.mxu0 %v1229_v3  ;;  %279 = vmatprep.mubr.f32.mxu1 %v1229_v3 }
   0x2   :  { %231 = vmatprep.subr.mxu1 %v1259_v0  ;;  %v1277_v4 = vld [vmem:[%s1633_s2 + $0x60] sm:$0xff]  ;;  %v1283_v5 = vld [vmem:[%s1633_s2 + $0x58] sm:$0xff]  ;;  %v1289_v6 = vld [vmem:[%s1633_s2 + $0x50] sm:$0xff]  ;;  %v30_v21 = vshrl.u32 %v29_v20, 7 }
   0x3   :  { %232 = vmatpush1.msra.mxu1 %v1264_v1  ;;  %v26_v7 = vld [vmem:[%s1634_s1 + $0x8] sm:$0xff]  ;;  %v25_v9 = vld [vmem:[%s1634_s1] sm:$0xff]  ;;  %v1316_v12 = vld [vmem:[%s1633_s2 + $0x38] sm:$0xff] }
   0x4   :  { %233 = vmatprep.subr.mxu1 %v1269_v2  ;;  %v1298_v8 = vld [vmem:[%s1633_s2 + $0x48] sm:$0xff]  ;;  %94 = vmatprep.subr.mxu0 %v26_v7  ;;  %v17_v10 = vld [vmem:[%s1635_s0] sm:$0xff]  ;;  %v1323_v13 = vld [vmem:[%s1633_s2 + $0x30] sm:$0xff]  ;;  %v31_v22 = vsub.s32 0, %v30_v21  ;;  %v35_v25 = vsub.s32 1, %v30_v21 }
   0x5   :  { %234 = vmatpush1.msra.mxu1 %v1277_v4  ;;  %v1310_v11 = vld [vmem:[%s1633_s2 + $0x40] sm:$0xff]  ;;  %95 = vmatpush1.msra.mxu0 %v25_v9  ;;  %v1330_v14 = vld [vmem:[%s1633_s2 + $0x28] sm:$0xff]  ;;  %v1344_v16 = vld [vmem:[%s1633_s2 + $0x18] sm:$0xff] }
   0x6   :  { %235 = vmatprep.subr.mxu1 %v1283_v5  ;;  %1093 = vmatmul.mubr.msk.f32.vlgmr.msra.gmra.mxu0 %vm39_vm0, %v17_v10  ;;  %v1337_v15 = vld [vmem:[%s1633_s2 + $0x20] sm:$0xff]  ;;  %v1351_v17 = vld [vmem:[%s1633_s2 + $0x10] sm:$0xff]  ;;  %v1358_v18 = vld [vmem:[%s1633_s2 + $0x8] sm:$0xff] }
   0x7   :  { %236 = vmatpush1.msra.mxu1 %v1289_v6  ;;  %134 = vmatprep.mubr.f32.mxu0 %v1229_v3  ;;  %v1365_v19 = vld [vmem:[%s1633_s2] sm:$0xff]  ;;  %v18_v42 = vld [vmem:[%s1635_s0 + $0x8] sm:$0xff]  ;;  %v19_v21 = vld [vmem:[%s1635_s0 + $0x10] sm:$0xff] }
   0x8   :  { %237 = vmatprep.subr.mxu1 %v1298_v8  ;;  %450 = vmatprep.subr.mxu0 %v1259_v0  ;;  %v27_v23 = vld [vmem:[%s1636_s3] sm:$0x3] }
   0x9   :  { %238 = vmatpush1.msra.mxu1 %v1310_v11  ;;  %451 = vmatpush1.msra.mxu0 %v1264_v1  ;;  %v1404_v24 = vrot.slane %v27_v23, %v31_v22  ;;  %v1407_v28 = vrot.slane %v27_v23, %v35_v25  ;;  %v20_v22 = vld [vmem:[%s1635_s0 + $0x18] sm:$0xff]  ;;  %v21_v23 = vld [vmem:[%s1635_s0 + $0x20] sm:$0xff]  ;;  %v22_v25 = vld [vmem:[%s1635_s0 + $0x28] sm:$0xff] }
   0xa   :  { %239 = vmatprep.subr.mxu1 %v1316_v12  ;;  %452 = vmatprep.subr.mxu0 %v1269_v2 }
   0xb   :  { %240 = vmatpush1.msra.mxu1 %v1323_v13  ;;  %453 = vmatpush1.msra.mxu0 %v1277_v4 }
   0xc   :  { %241 = vmatprep.subr.mxu1 %v1330_v14  ;;  %454 = vmatprep.subr.mxu0 %v1283_v5 }
   0xd   :  { %242 = vmatpush1.msra.mxu1 %v1337_v15  ;;  %455 = vmatpush1.msra.mxu0 %v1289_v6 }
   0xe   :  { %243 = vmatprep.subr.mxu1 %v1344_v16  ;;  %456 = vmatprep.subr.mxu0 %v1298_v8 }
   0xf   :  { %244 = vmatpush1.msra.mxu1 %v1351_v17  ;;  %457 = vmatpush1.msra.mxu0 %v1310_v11 }
  0x10   :  { %245 = vmatprep.subr.mxu1 %v1358_v18  ;;  %458 = vmatprep.subr.mxu0 %v1316_v12 }
  0x11   :  { %246 = vmatpush1.msra.mxu1 %v1365_v19  ;;  %459 = vmatpush1.msra.mxu0 %v1323_v13 }
  0x12   :  { %280 = vmatmul.mubr.f32.vlgmr.msra.gmra.mxu1 %v1229_v3  ;;  %340 = vmatprep.subr.mxu1 %v1259_v0 }
  0x13   :  { %341 = vmatpush1.msra.mxu1 %v1264_v1  ;;  %388 = vmatprep.mubr.f32.mxu1 %v1229_v3 }
  0x14   :  { %342 = vmatprep.subr.mxu1 %v1269_v2  ;;  %460 = vmatprep.subr.mxu0 %v1330_v14 }
  0x15   :  { %343 = vmatpush1.msra.mxu1 %v1277_v4  ;;  %461 = vmatpush1.msra.mxu0 %v1337_v15 }
  0x16   :  { %344 = vmatprep.subr.mxu1 %v1283_v5  ;;  %462 = vmatprep.subr.mxu0 %v1344_v16 }
  0x17   :  { %345 = vmatpush1.msra.mxu1 %v1289_v6  ;;  %463 = vmatpush1.msra.mxu0 %v1351_v17 }
  0x18   :  { %346 = vmatprep.subr.mxu1 %v1298_v8  ;;  %464 = vmatprep.subr.mxu0 %v1358_v18 }
  0x19   :  { %347 = vmatpush1.msra.mxu1 %v1310_v11  ;;  %465 = vmatpush1.msra.mxu0 %v1365_v19 }
  0x1a   :  { %348 = vmatprep.subr.mxu1 %v1316_v12  ;;  %670 = vmatprep.subr.mxu0 %v1259_v0 }
  0x1b   :  { %349 = vmatpush1.msra.mxu1 %v1323_v13  ;;  %1094 = vmatmul.mubr.msk.f32.gmra.mxu0 %vm39_vm0, %v18_v42 }
  0x1c   :  { %350 = vmatprep.subr.mxu1 %v1330_v14  ;;  %140 = vmatprep.mubr.f32.mxu0 %v1229_v3 }
  0x1d   :  { %351 = vmatpush1.msra.mxu1 %v1337_v15 }
  0x1e   :  { %352 = vmatprep.subr.mxu1 %v1344_v16 }
  0x1f   :  { %353 = vmatpush1.msra.mxu1 %v1351_v17  ;;  %1095 = vmatmul.mubr.msk.f32.gmra.mxu0 %vm39_vm0, %v19_v21 }
  0x20   :  { %354 = vmatprep.subr.mxu1 %v1358_v18  ;;  %146 = vmatprep.mubr.f32.mxu0 %v1229_v3 }
  0x21   :  { %355 = vmatpush1.msra.mxu1 %v1365_v19 }
  0x22   :  { %560 = vmatprep.subr.mxu1 %v1259_v0 }
  0x23   :  { %1096 = vmatmul.mubr.msk.f32.gmra.mxu0 %vm39_vm0, %v20_v22 }
  0x24   :  { %152 = vmatprep.mubr.f32.mxu0 %v1229_v3 }
  0x27   :  { %1097 = vmatmul.mubr.msk.f32.gmra.mxu0 %vm39_vm0, %v21_v23 }
  0x28   :  { %158 = vmatprep.mubr.f32.mxu0 %v1229_v3 }
  0x2b   :  { %1098 = vmatmul.mubr.msk.f32.gmra.mxu0 %vm39_vm0, %v22_v25 }
  0x2c   :  { %164 = vmatprep.mubr.f32.mxu0 %v1229_v3 }
  0xc6   :  { %v130_v26 = vpop.f32.mrf.mxu0 }
  0xc7   :  { %v131_v27 = vadd.f32 %v130_v26, %v1404_v24  ;;  %v23_v26 = vld [vmem:[%s1635_s0 + $0x30] sm:$0xff] }
  0xc8   :  { %v132_v29 = vpop.f32.mrf.mxu0  ;;  %1099 = vmatmul.mubr.msk.f32.gmra.mxu0 %vm39_vm0, %v23_v26 }
  0xc9   :  { %v133_v31 = vadd.f32 %v132_v29, %v1407_v28  ;;  %170 = vmatprep.mubr.f32.mxu0 %v1229_v3 }
  0xd2   :  { %v281_v30 = vpop.f32.mrf.mxu1 }
  0xd3   :  { %v286_v32 = vadd.f32 %v281_v30, %v131_v27  ;;  %v24_v27 = vld [vmem:[%s1635_s0 + $0x38] sm:$0xff] }
  0xd4   :  { %v283_v33 = vpop.f32.mrf.mxu1  ;;  %1100 = vmatmul.mubr.msk.f32.gmra.mxu0 %vm39_vm0, %v24_v27 }
  0xd5   :  { %v287_v34 = vadd.f32 %v283_v33, %v133_v31  ;;  %v1101_v36 = vmul.f32 -1.442695, %v286_v32  ;;  %498 = vmatprep.mubr.f32.mxu0 %v1229_v3 }
  0xd7   :  { %1133 = vtanh.f32 %v287_v34  ;;  %v1102_v47 = vmul.f32 -1.442695, %v287_v34 }
  0xd8   :  { %1135 = vpow2.f32 %v1101_v36 }
  0xdb   :  { %v136_v53 = vpop.f32.mrf.mxu0 }
  0xdc   :  { %v137_v54 = vadd.f32 %v136_v53, %v1404_v24 }
  0xdd   :  { %v138_v55 = vpop.f32.mrf.mxu0 }
  0xde   :  { %v139_v57 = vadd.f32 %v138_v55, %v1407_v28 }
  0xe4   :  { %v1134_v35 = vpop.eup %1133 }
  0xe5   :  { %303 = vrot.lane.b32.xlu0 %v1134_v35, %s1230_s27  ;;  %v1136_v37 = vpop.eup %1135 }
  0xe6   :  { %v294_v38 = vadd.f32 1.0, %v1136_v37 }
  0xe8   :  { %1137 = vrcp.f32 %v294_v38 }
  0xf5   :  { %v1138_v39 = vpop.eup %1137 }
  0xf6   :  { %v301_v43 = vmul.f32 0.0, %v1138_v39 }
 0x157   :  { %v304_v40 = vpop.permute.xlu0 %303 }
 0x158   :  { %v306_v41 = vmul.f32 %v1138_v39, %v304_v40  ;;  %v142_v39 = vpop.f32.mrf.mxu0 }
 0x15a   :  { %308 = vrot.lane.b32.xlu0 %v306_v41, %s1230_s27  ;;  %v144_v40 = vpop.f32.mrf.mxu0 }
 0x15b   :  { %v145_v53 = vadd.f32 %v144_v40, %v1407_v28 }
 0x15c   :  { %v148_v41 = vpop.f32.mrf.mxu0 }
 0x15e   :  { %v150_v42 = vpop.f32.mrf.mxu0 }
 0x1cc   :  { %v309_v44 = vpop.permute.xlu0 %308 }
 0x1cd   :  { %v1417_v45 = vadd.f32 %v309_v44, %v301_v43  ;;  %v1501_v43 = vpop.f32.mrf.mxu0 }
 0x1cf   :  { %1139 = vtanh.f32 %v1417_v45  ;;  %v1503_v44 = vpop.f32.mrf.mxu0 }
 0x1d0   :  { %1141 = vpow2.f32 %v1102_v47 }
 0x1dc   :  { %v1140_v46 = vpop.eup %1139 }
 0x1dd   :  { %314 = vrot.lane.b32.xlu1 %v1140_v46, %s1230_s27  ;;  %v1142_v48 = vpop.eup %1141 }
 0x1de   :  { %v295_v49 = vadd.f32 1.0, %v1142_v48 }
 0x1e0   :  { %1143 = vrcp.f32 %v295_v49 }
 0x1ed   :  { %v1144_v50 = vpop.eup %1143 }
 0x24f   :  { %v315_v51 = vpop.permute.xlu1 %314 }
 0x250   :  { %v317_v52 = vmul.f32 %v1144_v50, %v315_v51  ;;  %v143_v51 = vadd.f32 %v142_v39, %v1404_v24 }
 0x252   :  { %318 = vst.msk [vmem:[%s1637_s4] sm:$0xff] %vm211_vm1, %v317_v52  ;;  %1103 = vmatmul.mubr.msk.f32.vlgmr.msra.gmra.mxu1 %vm211_vm1, %v317_v52 }
 0x253   :  { %561 = vmatpush1.msra.mxu1 %v1264_v1  ;;  %608 = vmatprep.mubr.f32.mxu1 %v1229_v3 }
 0x254   :  { %562 = vmatprep.subr.mxu1 %v1269_v2 }
 0x255   :  { %563 = vmatpush1.msra.mxu1 %v1277_v4 }
 0x256   :  { %564 = vmatprep.subr.mxu1 %v1283_v5 }
 0x257   :  { %565 = vmatpush1.msra.mxu1 %v1289_v6 }
 0x258   :  { %566 = vmatprep.subr.mxu1 %v1298_v8 }
 0x259   :  { %567 = vmatpush1.msra.mxu1 %v1310_v11 }
 0x25a   :  { %568 = vmatprep.subr.mxu1 %v1316_v12 }
 0x25b   :  { %569 = vmatpush1.msra.mxu1 %v1323_v13 }
 0x25c   :  { %570 = vmatprep.subr.mxu1 %v1330_v14 }
 0x25d   :  { %571 = vmatpush1.msra.mxu1 %v1337_v15 }
 0x25e   :  { %572 = vmatprep.subr.mxu1 %v1344_v16 }
 0x25f   :  { %573 = vmatpush1.msra.mxu1 %v1351_v17 }
 0x260   :  { %574 = vmatprep.subr.mxu1 %v1358_v18 }
 0x261   :  { %575 = vmatpush1.msra.mxu1 %v1365_v19 }
 0x262   :  { %780 = vmatprep.subr.mxu1 %v1259_v0 }
 0x312   :  { %v390_v56 = vpop.f32.mrf.mxu1 }
 0x313   :  { %v395_v58 = vadd.f32 %v390_v56, %v137_v54 }
 0x314   :  { %v392_v59 = vpop.f32.mrf.mxu1 }
 0x315   :  { %v396_v60 = vadd.f32 %v392_v59, %v139_v57  ;;  %v1104_v62 = vmul.f32 -1.442695, %v395_v58 }
 0x317   :  { %1145 = vtanh.f32 %v396_v60  ;;  %v1105_v33 = vmul.f32 -1.442695, %v396_v60 }
 0x318   :  { %1147 = vpow2.f32 %v1104_v62 }
 0x324   :  { %v1146_v61 = vpop.eup %1145 }
 0x325   :  { %412 = vrot.lane.b32.xlu1 %v1146_v61, %s1230_s27  ;;  %v1148_v63 = vpop.eup %1147 }
 0x326   :  { %v403_v7 = vadd.f32 1.0, %v1148_v63 }
 0x328   :  { %1149 = vrcp.f32 %v403_v7 }
 0x335   :  { %v1150_v9 = vpop.eup %1149 }
 0x336   :  { %v410_v29 = vmul.f32 %v1150_v9, %v1417_v45  ;;  %v1505_v45 = vpop.f32.mrf.mxu0 }
 0x338   :  { %v1507_v46 = vpop.f32.mrf.mxu0 }
 0x33a   :  { %v1509_v47 = vpop.f32.mrf.mxu0 }
 0x33c   :  { %v1511_v48 = vpop.f32.mrf.mxu0 }
 0x33e   :  { %v1513_v49 = vpop.f32.mrf.mxu0 }
 0x340   :  { %v1515_v50 = vpop.f32.mrf.mxu0 }
 0x397   :  { %v413_v10 = vpop.permute.xlu1 %412 }
 0x398   :  { %v415_v20 = vmul.f32 %v1150_v9, %v413_v10 }
 0x39a   :  { %417 = vrot.lane.b32.xlu0 %v415_v20, %s1230_s27 }
 0x40c   :  { %v418_v30 = vpop.permute.xlu0 %417 }
 0x40d   :  { %v420_v31 = vadd.f32 %v418_v30, %v410_v29  ;;  %v149_v29 = vadd.f32 %v148_v41, %v1404_v24 }
 0x40f   :  { %1151 = vtanh.f32 %v420_v31 }
 0x410   :  { %1153 = vpow2.f32 %v1105_v33 }
 0x41c   :  { %v1152_v32 = vpop.eup %1151 }
 0x41d   :  { %423 = vrot.lane.b32.xlu1 %v1152_v32, %s1230_s27  ;;  %v1154_v34 = vpop.eup %1153 }
 0x41e   :  { %v404_v35 = vadd.f32 1.0, %v1154_v34 }
 0x420   :  { %1155 = vrcp.f32 %v404_v35 }
 0x42d   :  { %v1156_v36 = vpop.eup %1155 }
 0x48f   :  { %v424_v37 = vpop.permute.xlu1 %423 }
 0x490   :  { %v426_v38 = vmul.f32 %v1156_v36, %v424_v37 }
 0x492   :  { %1106 = vst.msk [vmem:[%s1637_s4 + $0x8] sm:$0xff] %vm211_vm1, %v426_v38  ;;  %1107 = vmatmul.mubr.msk.f32.vlgmr.msra.gmra.mxu0 %vm211_vm1, %v426_v38 }
 0x493   :  { %671 = vmatpush1.msra.mxu0 %v1264_v1  ;;  %718 = vmatprep.mubr.f32.mxu0 %v1229_v3 }
 0x494   :  { %672 = vmatprep.subr.mxu0 %v1269_v2 }
 0x495   :  { %673 = vmatpush1.msra.mxu0 %v1277_v4 }
 0x496   :  { %674 = vmatprep.subr.mxu0 %v1283_v5 }
 0x497   :  { %675 = vmatpush1.msra.mxu0 %v1289_v6 }
 0x498   :  { %676 = vmatprep.subr.mxu0 %v1298_v8 }
 0x499   :  { %677 = vmatpush1.msra.mxu0 %v1310_v11 }
 0x49a   :  { %678 = vmatprep.subr.mxu0 %v1316_v12 }
 0x49b   :  { %679 = vmatpush1.msra.mxu0 %v1323_v13 }
 0x49c   :  { %680 = vmatprep.subr.mxu0 %v1330_v14 }
 0x49d   :  { %681 = vmatpush1.msra.mxu0 %v1337_v15 }
 0x49e   :  { %682 = vmatprep.subr.mxu0 %v1344_v16 }
 0x49f   :  { %683 = vmatpush1.msra.mxu0 %v1351_v17 }
 0x4a0   :  { %684 = vmatprep.subr.mxu0 %v1358_v18 }
 0x4a1   :  { %685 = vmatpush1.msra.mxu0 %v1365_v19 }
 0x4a2   :  { %890 = vmatprep.subr.mxu0 %v1259_v0 }
 0x552   :  { %v500_v52 = vpop.f32.mrf.mxu0 }
 0x553   :  { %v505_v54 = vadd.f32 %v500_v52, %v143_v51 }
 0x554   :  { %v502_v55 = vpop.f32.mrf.mxu0 }
 0x555   :  { %v506_v56 = vadd.f32 %v502_v55, %v145_v53  ;;  %v1108_v58 = vmul.f32 -1.442695, %v505_v54 }
 0x557   :  { %1157 = vtanh.f32 %v506_v56  ;;  %v1109_v21 = vmul.f32 -1.442695, %v506_v56 }
 0x558   :  { %1159 = vpow2.f32 %v1108_v58 }
 0x564   :  { %v1158_v57 = vpop.eup %1157 }
 0x565   :  { %522 = vrot.lane.b32.xlu0 %v1158_v57, %s1230_s27  ;;  %v1160_v59 = vpop.eup %1159 }
 0x566   :  { %v513_v60 = vadd.f32 1.0, %v1160_v59  ;;  %v155_v59 = vadd.f32 %v1501_v43, %v1404_v24 }
 0x568   :  { %1161 = vrcp.f32 %v513_v60 }
 0x575   :  { %v1162_v61 = vpop.eup %1161 }
 0x576   :  { %v520_v7 = vmul.f32 %v1162_v61, %v420_v31  ;;  %v151_v31 = vadd.f32 %v150_v42, %v1407_v28 }
 0x5d7   :  { %v523_v62 = vpop.permute.xlu0 %522 }
 0x5d8   :  { %v525_v63 = vmul.f32 %v1162_v61, %v523_v62  ;;  %v157_v61 = vadd.f32 %v1503_v44, %v1407_v28 }
 0x5da   :  { %527 = vrot.lane.b32.xlu1 %v525_v63, %s1230_s27 }
 0x64c   :  { %v528_v9 = vpop.permute.xlu1 %527 }
 0x64d   :  { %v530_v10 = vadd.f32 %v528_v9, %v520_v7 }
 0x64f   :  { %1163 = vtanh.f32 %v530_v10 }
 0x650   :  { %1165 = vpow2.f32 %v1109_v21 }
 0x65c   :  { %v1164_v20 = vpop.eup %1163 }
 0x65d   :  { %533 = vrot.lane.b32.xlu0 %v1164_v20, %s1230_s27  ;;  %v1166_v22 = vpop.eup %1165 }
 0x65e   :  { %v514_v23 = vadd.f32 1.0, %v1166_v22 }
 0x660   :  { %1167 = vrcp.f32 %v514_v23 }
 0x66d   :  { %v1168_v25 = vpop.eup %1167 }
 0x6cf   :  { %v534_v26 = vpop.permute.xlu0 %533 }
 0x6d0   :  { %v536_v27 = vmul.f32 %v1168_v25, %v534_v26 }
 0x6d2   :  { %1110 = vst.msk [vmem:[%s1637_s4 + $0x10] sm:$0xff] %vm211_vm1, %v536_v27  ;;  %1111 = vmatmul.mubr.msk.f32.vlgmr.msra.gmra.mxu1 %vm211_vm1, %v536_v27 }
 0x6d3   :  { %781 = vmatpush1.msra.mxu1 %v1264_v1  ;;  %828 = vmatprep.mubr.f32.mxu1 %v1229_v3 }
 0x6d4   :  { %782 = vmatprep.subr.mxu1 %v1269_v2 }
 0x6d5   :  { %783 = vmatpush1.msra.mxu1 %v1277_v4 }
 0x6d6   :  { %784 = vmatprep.subr.mxu1 %v1283_v5 }
 0x6d7   :  { %785 = vmatpush1.msra.mxu1 %v1289_v6 }
 0x6d8   :  { %786 = vmatprep.subr.mxu1 %v1298_v8 }
 0x6d9   :  { %787 = vmatpush1.msra.mxu1 %v1310_v11 }
 0x6da   :  { %788 = vmatprep.subr.mxu1 %v1316_v12 }
 0x6db   :  { %789 = vmatpush1.msra.mxu1 %v1323_v13 }
 0x6dc   :  { %790 = vmatprep.subr.mxu1 %v1330_v14 }
 0x6dd   :  { %791 = vmatpush1.msra.mxu1 %v1337_v15 }
 0x6de   :  { %792 = vmatprep.subr.mxu1 %v1344_v16 }
 0x6df   :  { %793 = vmatpush1.msra.mxu1 %v1351_v17 }
 0x6e0   :  { %794 = vmatprep.subr.mxu1 %v1358_v18 }
 0x6e1   :  { %795 = vmatpush1.msra.mxu1 %v1365_v19 }
 0x6e2   :  { %1000 = vmatprep.subr.mxu1 %v1259_v0 }
 0x792   :  { %v610_v30 = vpop.f32.mrf.mxu1 }
 0x793   :  { %v615_v32 = vadd.f32 %v610_v30, %v149_v29 }
 0x794   :  { %v612_v33 = vpop.f32.mrf.mxu1 }
 0x795   :  { %v616_v34 = vadd.f32 %v612_v33, %v151_v31  ;;  %v1112_v36 = vmul.f32 -1.442695, %v615_v32 }
 0x797   :  { %1169 = vtanh.f32 %v616_v34  ;;  %v1113_v53 = vmul.f32 -1.442695, %v616_v34 }
 0x798   :  { %1171 = vpow2.f32 %v1112_v36 }
 0x7a4   :  { %v1170_v35 = vpop.eup %1169 }
 0x7a5   :  { %632 = vrot.lane.b32.xlu1 %v1170_v35, %s1230_s27  ;;  %v1172_v37 = vpop.eup %1171 }
 0x7a6   :  { %v623_v38 = vadd.f32 1.0, %v1172_v37 }
 0x7a8   :  { %1173 = vrcp.f32 %v623_v38 }
 0x7b5   :  { %v1174_v39 = vpop.eup %1173 }
 0x7b6   :  { %v630_v41 = vmul.f32 %v1174_v39, %v530_v10 }
 0x817   :  { %v633_v40 = vpop.permute.xlu1 %632 }
 0x818   :  { %v635_v0 = vmul.f32 %v1174_v39, %v633_v40  ;;  %v167_v40 = vadd.f32 %v1509_v47, %v1404_v24 }
 0x81a   :  { %637 = vrot.lane.b32.xlu0 %v635_v0, %s1230_s27 }
 0x88c   :  { %v638_v51 = vpop.permute.xlu0 %637 }
 0x88d   :  { %v640_v42 = vadd.f32 %v638_v51, %v630_v41  ;;  %v169_v41 = vadd.f32 %v1511_v48, %v1407_v28 }
 0x88f   :  { %1175 = vtanh.f32 %v640_v42 }
 0x890   :  { %1177 = vpow2.f32 %v1113_v53 }
 0x89c   :  { %v1176_v52 = vpop.eup %1175 }
 0x89d   :  { %643 = vrot.lane.b32.xlu1 %v1176_v52, %s1230_s27  ;;  %v1178_v54 = vpop.eup %1177 }
 0x89e   :  { %v624_v55 = vadd.f32 1.0, %v1178_v54 }
 0x8a0   :  { %1179 = vrcp.f32 %v624_v55 }
 0x8ad   :  { %v1180_v56 = vpop.eup %1179 }
 0x90f   :  { %v644_v57 = vpop.permute.xlu1 %643 }
 0x910   :  { %v646_v58 = vmul.f32 %v1180_v56, %v644_v57 }
 0x912   :  { %1114 = vst.msk [vmem:[%s1637_s4 + $0x18] sm:$0xff] %vm211_vm1, %v646_v58  ;;  %1115 = vmatmul.mubr.msk.f32.vlgmr.msra.gmra.mxu0 %vm211_vm1, %v646_v58 }
 0x913   :  { %891 = vmatpush1.msra.mxu0 %v1264_v1  ;;  %938 = vmatprep.mubr.f32.mxu0 %v1229_v3 }
 0x914   :  { %892 = vmatprep.subr.mxu0 %v1269_v2 }
 0x915   :  { %893 = vmatpush1.msra.mxu0 %v1277_v4 }
 0x916   :  { %894 = vmatprep.subr.mxu0 %v1283_v5 }
 0x917   :  { %895 = vmatpush1.msra.mxu0 %v1289_v6 }
 0x918   :  { %896 = vmatprep.subr.mxu0 %v1298_v8 }
 0x919   :  { %897 = vmatpush1.msra.mxu0 %v1310_v11 }
 0x91a   :  { %898 = vmatprep.subr.mxu0 %v1316_v12 }
 0x91b   :  { %899 = vmatpush1.msra.mxu0 %v1323_v13 }
 0x91c   :  { %900 = vmatprep.subr.mxu0 %v1330_v14 }
 0x91d   :  { %901 = vmatpush1.msra.mxu0 %v1337_v15 }
 0x91e   :  { %902 = vmatprep.subr.mxu0 %v1344_v16 }
 0x91f   :  { %903 = vmatpush1.msra.mxu0 %v1351_v17 }
 0x920   :  { %904 = vmatprep.subr.mxu0 %v1358_v18 }
 0x921   :  { %905 = vmatpush1.msra.mxu0 %v1365_v19 }
 0x9d2   :  { %v720_v60 = vpop.f32.mrf.mxu0 }
 0x9d3   :  { %v725_v62 = vadd.f32 %v720_v60, %v155_v59 }
 0x9d4   :  { %v722_v63 = vpop.f32.mrf.mxu0 }
 0x9d5   :  { %v726_v7 = vadd.f32 %v722_v63, %v157_v61  ;;  %v1116_v10 = vmul.f32 -1.442695, %v725_v62 }
 0x9d7   :  { %1181 = vtanh.f32 %v726_v7  ;;  %v1117_v29 = vmul.f32 -1.442695, %v726_v7 }
 0x9d8   :  { %1183 = vpow2.f32 %v1116_v10 }
 0x9e4   :  { %v1182_v9 = vpop.eup %1181 }
 0x9e5   :  { %742 = vrot.lane.b32.xlu0 %v1182_v9, %s1230_s27  ;;  %v1184_v20 = vpop.eup %1183 }
 0x9e6   :  { %v733_v21 = vadd.f32 1.0, %v1184_v20 }
 0x9e8   :  { %1185 = vrcp.f32 %v733_v21  ;;  %v173_v21 = vadd.f32 %v1513_v49, %v1404_v24 }
 0x9f5   :  { %v1186_v22 = vpop.eup %1185 }
 0x9f6   :  { %v740_v43 = vmul.f32 %v1186_v22, %v640_v42 }
 0xa57   :  { %v743_v23 = vpop.permute.xlu0 %742 }
 0xa58   :  { %v745_v25 = vmul.f32 %v1186_v22, %v743_v23  ;;  %v175_v23 = vadd.f32 %v1515_v50, %v1407_v28 }
 0xa5a   :  { %747 = vrot.lane.b32.xlu1 %v745_v25, %s1230_s27 }
 0xacc   :  { %v748_v26 = vpop.permute.xlu1 %747 }
 0xacd   :  { %v750_v44 = vadd.f32 %v748_v26, %v740_v43 }
 0xacf   :  { %1187 = vtanh.f32 %v750_v44 }
 0xad0   :  { %1189 = vpow2.f32 %v1117_v29 }
 0xadc   :  { %v1188_v27 = vpop.eup %1187 }
 0xadd   :  { %753 = vrot.lane.b32.xlu0 %v1188_v27, %s1230_s27  ;;  %v1190_v30 = vpop.eup %1189 }
 0xade   :  { %v734_v31 = vadd.f32 1.0, %v1190_v30 }
 0xae0   :  { %1191 = vrcp.f32 %v734_v31 }
 0xaed   :  { %v1192_v32 = vpop.eup %1191 }
 0xb4f   :  { %v754_v33 = vpop.permute.xlu0 %753 }
 0xb50   :  { %v756_v34 = vmul.f32 %v1192_v32, %v754_v33 }
 0xb52   :  { %1118 = vst.msk [vmem:[%s1637_s4 + $0x20] sm:$0xff] %vm211_vm1, %v756_v34  ;;  %1119 = vmatmul.mubr.msk.f32.vlgmr.msra.gmra.mxu1 %vm211_vm1, %v756_v34 }
 0xb53   :  { %1001 = vmatpush1.msra.mxu1 %v1264_v1  ;;  %1048 = vmatprep.mubr.f32.mxu1 %v1229_v3  ;;  %v161_v1 = vadd.f32 %v1505_v45, %v1404_v24  ;;  %v163_v3 = vadd.f32 %v1507_v46, %v1407_v28 }
 0xb54   :  { %1002 = vmatprep.subr.mxu1 %v1269_v2 }
 0xb55   :  { %1003 = vmatpush1.msra.mxu1 %v1277_v4 }
 0xb56   :  { %1004 = vmatprep.subr.mxu1 %v1283_v5 }
 0xb57   :  { %1005 = vmatpush1.msra.mxu1 %v1289_v6 }
 0xb58   :  { %1006 = vmatprep.subr.mxu1 %v1298_v8 }
 0xb59   :  { %1007 = vmatpush1.msra.mxu1 %v1310_v11 }
 0xb5a   :  { %1008 = vmatprep.subr.mxu1 %v1316_v12 }
 0xb5b   :  { %1009 = vmatpush1.msra.mxu1 %v1323_v13 }
 0xb5c   :  { %1010 = vmatprep.subr.mxu1 %v1330_v14 }
 0xb5d   :  { %1011 = vmatpush1.msra.mxu1 %v1337_v15 }
 0xb5e   :  { %1012 = vmatprep.subr.mxu1 %v1344_v16 }
 0xb5f   :  { %1013 = vmatpush1.msra.mxu1 %v1351_v17 }
 0xb60   :  { %1014 = vmatprep.subr.mxu1 %v1358_v18 }
 0xb61   :  { %1015 = vmatpush1.msra.mxu1 %v1365_v19 }
 0xc12   :  { %v830_v2 = vpop.f32.mrf.mxu1 }
 0xc13   :  { %v835_v4 = vadd.f32 %v830_v2, %v161_v1 }
 0xc14   :  { %v832_v5 = vpop.f32.mrf.mxu1 }
 0xc15   :  { %v836_v6 = vadd.f32 %v832_v5, %v163_v3  ;;  %v1120_v11 = vmul.f32 -1.442695, %v835_v4 }
 0xc17   :  { %1193 = vtanh.f32 %v836_v6  ;;  %v1121_v46 = vmul.f32 -1.442695, %v836_v6 }
 0xc18   :  { %1195 = vpow2.f32 %v1120_v11 }
 0xc24   :  { %v1194_v8 = vpop.eup %1193 }
 0xc25   :  { %852 = vrot.lane.b32.xlu1 %v1194_v8, %s1230_s27  ;;  %v1196_v12 = vpop.eup %1195 }
 0xc26   :  { %v843_v13 = vadd.f32 1.0, %v1196_v12 }
 0xc28   :  { %1197 = vrcp.f32 %v843_v13 }
 0xc35   :  { %v1198_v14 = vpop.eup %1197 }
 0xc36   :  { %v850_v17 = vmul.f32 %v1198_v14, %v750_v44 }
 0xc97   :  { %v853_v15 = vpop.permute.xlu1 %852 }
 0xc98   :  { %v855_v16 = vmul.f32 %v1198_v14, %v853_v15 }
 0xc9a   :  { %857 = vrot.lane.b32.xlu0 %v855_v16, %s1230_s27 }
 0xd0c   :  { %v858_v18 = vpop.permute.xlu0 %857 }
 0xd0d   :  { %v860_v19 = vadd.f32 %v858_v18, %v850_v17 }
 0xd0f   :  { %1199 = vtanh.f32 %v860_v19 }
 0xd10   :  { %1201 = vpow2.f32 %v1121_v46 }
 0xd1c   :  { %v1200_v45 = vpop.eup %1199 }
 0xd1d   :  { %863 = vrot.lane.b32.xlu1 %v1200_v45, %s1230_s27  ;;  %v1202_v35 = vpop.eup %1201 }
 0xd1e   :  { %v844_v36 = vadd.f32 1.0, %v1202_v35 }
 0xd20   :  { %1203 = vrcp.f32 %v844_v36 }
 0xd2d   :  { %v1204_v37 = vpop.eup %1203 }
 0xd8f   :  { %v864_v38 = vpop.permute.xlu1 %863 }
 0xd90   :  { %v866_v39 = vmul.f32 %v1204_v37, %v864_v38 }
 0xd92   :  { %1122 = vst.msk [vmem:[%s1637_s4 + $0x28] sm:$0xff] %vm211_vm1, %v866_v39  ;;  %1123 = vmatmul.mubr.msk.f32.vlgmr.msra.gmra.mxu0 %vm211_vm1, %v866_v39 }
 0xe52   :  { %v940_v0 = vpop.f32.mrf.mxu0 }
 0xe53   :  { %v945_v51 = vadd.f32 %v940_v0, %v167_v40 }
 0xe54   :  { %v942_v42 = vpop.f32.mrf.mxu0 }
 0xe55   :  { %v946_v52 = vadd.f32 %v942_v42, %v169_v41  ;;  %v1124_v54 = vmul.f32 -1.442695, %v945_v51 }
 0xe57   :  { %1205 = vtanh.f32 %v946_v52  ;;  %v1125_v62 = vmul.f32 -1.442695, %v946_v52 }
 0xe58   :  { %1207 = vpow2.f32 %v1124_v54 }
 0xe64   :  { %v1206_v53 = vpop.eup %1205 }
 0xe65   :  { %962 = vrot.lane.b32.xlu0 %v1206_v53, %s1230_s27  ;;  %v1208_v55 = vpop.eup %1207 }
 0xe66   :  { %v953_v56 = vadd.f32 1.0, %v1208_v55 }
 0xe68   :  { %1209 = vrcp.f32 %v953_v56 }
 0xe75   :  { %v1210_v57 = vpop.eup %1209 }
 0xe76   :  { %v960_v47 = vmul.f32 %v1210_v57, %v860_v19 }
 0xed7   :  { %v963_v58 = vpop.permute.xlu0 %962 }
 0xed8   :  { %v965_v59 = vmul.f32 %v1210_v57, %v963_v58 }
 0xeda   :  { %967 = vrot.lane.b32.xlu1 %v965_v59, %s1230_s27 }
 0xf4c   :  { %v968_v60 = vpop.permute.xlu1 %967 }
 0xf4d   :  { %v970_v48 = vadd.f32 %v968_v60, %v960_v47 }
 0xf4f   :  { %1211 = vtanh.f32 %v970_v48 }
 0xf50   :  { %1213 = vpow2.f32 %v1125_v62 }
 0xf5c   :  { %v1212_v61 = vpop.eup %1211 }
 0xf5d   :  { %973 = vrot.lane.b32.xlu0 %v1212_v61, %s1230_s27  ;;  %v1214_v63 = vpop.eup %1213 }
 0xf5e   :  { %v954_v7 = vadd.f32 1.0, %v1214_v63 }
 0xf60   :  { %1215 = vrcp.f32 %v954_v7 }
 0xf6d   :  { %v1216_v9 = vpop.eup %1215 }
 0xfcf   :  { %v974_v10 = vpop.permute.xlu0 %973 }
 0xfd0   :  { %v976_v20 = vmul.f32 %v1216_v9, %v974_v10 }
 0xfd2   :  { %1126 = vst.msk [vmem:[%s1637_s4 + $0x30] sm:$0xff] %vm211_vm1, %v976_v20  ;;  %1127 = vmatmul.mubr.msk.f32.vlgmr.msra.gmra.mxu1 %vm211_vm1, %v976_v20 }
0x1092   :  { %v1050_v22 = vpop.f32.mrf.mxu1 }
0x1093   :  { %v1055_v25 = vadd.f32 %v1050_v22, %v173_v21 }
0x1094   :  { %v1052_v43 = vpop.f32.mrf.mxu1 }
0x1095   :  { %v1056_v26 = vadd.f32 %v1052_v43, %v175_v23  ;;  %v1128_v27 = vmul.f32 -1.442695, %v1055_v25 }
0x1097   :  { %1217 = vtanh.f32 %v1056_v26  ;;  %v1129_v34 = vmul.f32 -1.442695, %v1056_v26 }
0x1098   :  { %1219 = vpow2.f32 %v1128_v27 }
0x10a4   :  { %v1218_v44 = vpop.eup %1217 }
0x10a5   :  { %1072 = vrot.lane.b32.xlu1 %v1218_v44, %s1230_s27  ;;  %v1220_v29 = vpop.eup %1219 }
0x10a6   :  { %v1063_v30 = vadd.f32 1.0, %v1220_v29 }
0x10a8   :  { %1221 = vrcp.f32 %v1063_v30 }
0x10b5   :  { %v1222_v31 = vpop.eup %1221 }
0x10b6   :  { %v1070_v24 = vmul.f32 %v1222_v31, %v970_v48 }
0x1117   :  { %v1073_v32 = vpop.permute.xlu1 %1072 }
0x1118   :  { %v1075_v33 = vmul.f32 %v1222_v31, %v1073_v32 }
0x111a   :  { %1077 = vrot.lane.b32.xlu0 %v1075_v33, %s1230_s27 }
0x118c   :  { %v1078_v49 = vpop.permute.xlu0 %1077 }
0x118d   :  { %v1080_v28 = vadd.f32 %v1078_v49, %v1070_v24 }
0x118f   :  { %1223 = vtanh.f32 %v1080_v28 }
0x1190   :  { %1225 = vpow2.f32 %v1129_v34 }
0x119c   :  { %v1224_v50 = vpop.eup %1223 }
0x119d   :  { %1083 = vrot.lane.b32.xlu1 %v1224_v50, %s1230_s27  ;;  %v1226_v1 = vpop.eup %1225 }
0x119e   :  { %v1064_v2 = vadd.f32 1.0, %v1226_v1 }
0x11a0   :  { %1227 = vrcp.f32 %v1064_v2 }
0x11ad   :  { %v1228_v3 = vpop.eup %1227 }
0x120f   :  { %v1084_v4 = vpop.permute.xlu1 %1083 }
0x1210   :  { %v1086_v5 = vmul.f32 %v1228_v3, %v1084_v4 }
0x1212   :  { %1130 = vst.msk [vmem:[%s1637_s4 + $0x38] sm:$0xff] %vm211_vm1, %v1086_v5 }

</bundles_post_ra>
